<compile_context>
chip_gen: v6e
topology: v6e:2x2x1
jax: 0.10.0
libtpu: 0.0.40
codegen_flags: <defaults>
</compile_context>

<pallas_src>
import functools

import jax
import jax.numpy as jnp
from jax.experimental import pallas as pl
from jax.experimental.pallas import tpu as pltpu

LATENT_DIM = 32
COND_DIM = 16
DATA_DIM = 64
HIDDEN = 256


def _round_up(x, m):
    return (x + m - 1) // m * m


def _leaky_relu(x, slope=0.2):
    return jnp.where(x > 0, x, slope * x)


def _mlp_tail(h1_pre, b1_ref, w2_ref, b2_ref, w3_ref, b3_ref, o_ref):
    """Shared layers 2/3: f32 epilogues, bf16 MXU operands, f32 accumulation."""
    h1 = _leaky_relu(h1_pre + b1_ref[...])                           # f32 (bm, 256)
    h2 = jnp.dot(h1.astype(jnp.bfloat16), w2_ref[...],
                 preferred_element_type=jnp.float32)
    h2 = _leaky_relu(h2 + b2_ref[...])                               # f32 (bm, 256)
    out = jnp.dot(h2.astype(jnp.bfloat16), w3_ref[...],
                  preferred_element_type=jnp.float32)
    o_ref[...] = (out + b3_ref[...]).astype(o_ref.dtype)             # (bm, out_pad)


def _gen_kernel_cond(z_ref, c_ref, w1z_ref, w1c_ref, b1_ref,
                     w2_ref, b2_ref, w3_ref, b3_ref, o_ref):
    """Conditional path: h1 = z @ w1[:latent] + ctx @ w1[latent:] (no concat)."""
    h1 = jnp.dot(z_ref[...].astype(jnp.bfloat16), w1z_ref[...],
                 preferred_element_type=jnp.float32)
    h1 = h1 + jnp.dot(c_ref[...].astype(jnp.bfloat16), w1c_ref[...],
                      preferred_element_type=jnp.float32)
    _mlp_tail(h1, b1_ref, w2_ref, b2_ref, w3_ref, b3_ref, o_ref)


def _gen_kernel_uncond(z_ref, w1_ref, b1_ref, w2_ref, b2_ref,
                       w3_ref, b3_ref, o_ref):
    """context is None path."""
    h1 = jnp.dot(z_ref[...].astype(jnp.bfloat16), w1_ref[...],
                 preferred_element_type=jnp.float32)
    _mlp_tail(h1, b1_ref, w2_ref, b2_ref, w3_ref, b3_ref, o_ref)


@functools.partial(jax.jit, static_argnames=("block_m",))
def generator_forward(z, context, params, *, block_m=1024):
    """Pallas forward pass. z: (B, latent), context: (B, cond) or None."""
    w1, b1, w2, b2, w3, b3 = params
    B, latent_dim = z.shape
    data_dim = w3.shape[1]
    bf = jnp.bfloat16

    # --- lane-dense output: pad last layer to a multiple of 128 columns. ---
    out_pad = _round_up(data_dim, 128)
    if out_pad != data_dim:
        w3 = jnp.pad(w3, ((0, 0), (0, out_pad - data_dim)))
        b3 = jnp.pad(b3, ((0, 0), (0, out_pad - data_dim)))
    w2b, w3b = w2.astype(bf), w3.astype(bf)

    # --- batch tiling: big full-width tiles, pad B up to a tile multiple. ---
    bm = min(block_m, _round_up(B, 8))
    B_pad = _round_up(B, bm)
    if B_pad != B:
        z = jnp.pad(z, ((0, B_pad - B), (0, 0)))
        if context is not None:
            context = jnp.pad(context, ((0, B_pad - B), (0, 0)))
    grid = (B_pad // bm,)

    full = lambda a: pl.BlockSpec(a.shape, lambda i: (0,) * a.ndim)
    row_tile = lambda d: pl.BlockSpec((bm, d), lambda i: (i, 0))

    if context is None:
        kernel = _gen_kernel_uncond
        operands = (z, w1.astype(bf), b1, w2b, b2, w3b, b3)
        in_specs = [row_tile(latent_dim),
                    full(w1), full(b1), full(w2b), full(b2), full(w3b), full(b3)]
    else:
        cond_dim = context.shape[1]
        w1z = w1[:latent_dim].astype(bf)      # split w1 at trace time (no concat)
        w1c = w1[latent_dim:].astype(bf)
        kernel = _gen_kernel_cond
        operands = (z, context, w1z, w1c, b1, w2b, b2, w3b, b3)
        in_specs = [row_tile(latent_dim), row_tile(cond_dim),
                    full(w1z), full(w1c), full(b1),
                    full(w2b), full(b2), full(w3b), full(b3)]

    out = pl.pallas_call(
        kernel,
        out_shape=jax.ShapeDtypeStruct((B_pad, out_pad), z.dtype),
        grid_spec=pltpu.PrefetchScalarGridSpec(
            num_scalar_prefetch=0,
            grid=grid,
            in_specs=in_specs,
            out_specs=pl.BlockSpec((bm, out_pad), lambda i: (i, 0)),
        ),
        compiler_params=pltpu.CompilerParams(
            dimension_semantics=("parallel",)),
    )(*operands)

    return out[:B, :data_dim]


def init_params(key, latent_dim, condition_dim, data_dim):
    """Deterministic init mimicking nn.Linear default (uniform +-1/sqrt(fan_in))."""
    in_dim = latent_dim + condition_dim
    dims = [(in_dim, HIDDEN), (HIDDEN, HIDDEN), (HIDDEN, data_dim)]
    params = []
    for (fan_in, fan_out) in dims:
        key, kw, kb = jax.random.split(key, 3)
        bound = 1.0 / (fan_in ** 0.5)
        w = jax.random.uniform(kw, (fan_in, fan_out), jnp.float32, -bound, bound)
        b = jax.random.uniform(kb, (1, fan_out), jnp.float32, -bound, bound)
        params += [w, b]
    return tuple(params)


def reference_forward_bf16(z, context, params):
    """Reference with the same bf16-operand / f32-accum numerics as the kernel."""
    x = jnp.concatenate([z, context], axis=-1) if context is not None else z
    w1, b1, w2, b2, w3, b3 = params
    bf = jnp.bfloat16
    h1 = _leaky_relu(jnp.dot(x.astype(bf), w1.astype(bf),
                             preferred_element_type=jnp.float32) + b1)
    h2 = _leaky_relu(jnp.dot(h1.astype(bf), w2.astype(bf),
                             preferred_element_type=jnp.float32) + b2)
    return jnp.dot(h2.astype(bf), w3.astype(bf),
                   preferred_element_type=jnp.float32) + b3


def reference_forward_f32(z, context, params):
    x = jnp.concatenate([z, context], axis=-1) if context is not None else z
    w1, b1, w2, b2, w3, b3 = params
    h1 = _leaky_relu(x @ w1 + b1)
    h2 = _leaky_relu(h1 @ w2 + b2)
    return h2 @ w3 + b3


if __name__ == "__main__":
    key = jax.random.PRNGKey(0)
    kz, kc, kp = jax.random.split(key, 3)

    batch = 8
    z = jax.random.normal(kz, (batch, LATENT_DIM), jnp.float32)
    context = jax.random.normal(kc, (batch, COND_DIM), jnp.float32)
    params = init_params(kp, LATENT_DIM, COND_DIM, DATA_DIM)

    out = jax.block_until_ready(generator_forward(z, context, params))
    assert out.shape == (batch, DATA_DIM)
    ref_bf16 = reference_forward_bf16(z, context, params)
    ref_f32 = reference_forward_f32(z, context, params)
    assert jnp.allclose(out, ref_bf16, atol=2e-3, rtol=2e-3), "mismatch vs bf16 ref"
    assert jnp.allclose(out, ref_f32, atol=5e-2, rtol=5e-2), "mismatch vs f32 ref"

    # Second config: ragged batch + multi-step grid exercises padding/tiling.
    kz2, kc2 = jax.random.split(kz)
    batch2 = 200
    z2 = jax.random.normal(kz2, (batch2, LATENT_DIM), jnp.float32)
    c2 = jax.random.normal(kc2, (batch2, COND_DIM), jnp.float32)
    out2 = jax.block_until_ready(generator_forward(z2, c2, params, block_m=128))
    assert out2.shape == (batch2, DATA_DIM)
    assert jnp.allclose(out2, reference_forward_bf16(z2, c2, params),
                        atol=2e-3, rtol=2e-3), "mismatch vs bf16 ref (ragged batch)"

    print("KERNEL_OK")
</pallas_src>

<mosaic_0001>
module attributes {stable_mosaic.version = 11 : i64} {
  func.func @_gen_kernel_cond(%arg0: i32, %arg1: memref<8x32xf32, #tpu.memory_space<vmem>>, %arg2: memref<8x16xf32, #tpu.memory_space<vmem>>, %arg3: memref<32x256xbf16, #tpu.memory_space<vmem>>, %arg4: memref<16x256xbf16, #tpu.memory_space<vmem>>, %arg5: memref<1x256xf32, #tpu.memory_space<vmem>>, %arg6: memref<256x256xbf16, #tpu.memory_space<vmem>>, %arg7: memref<1x256xf32, #tpu.memory_space<vmem>>, %arg8: memref<256x128xbf16, #tpu.memory_space<vmem>>, %arg9: memref<1x128xf32, #tpu.memory_space<vmem>>, %arg10: memref<8x128xf32, #tpu.memory_space<vmem>>) attributes {dimension_semantics = [#tpu.dimension_semantics<parallel>], iteration_bounds = array<i64: 1>, scalar_prefetch = 0 : i64, scratch_operands = 0 : i64, tpu.core_type = #tpu.core_type<tc>, window_params = [{transform_indices = @transform_0, window_bounds = array<i64: 8, 32>}, {transform_indices = @transform_1, window_bounds = array<i64: 8, 16>}, {pipeline_mode = #tpu.pipeline_mode<synchronous>, transform_indices = @transform_2, window_bounds = array<i64: 32, 256>}, {pipeline_mode = #tpu.pipeline_mode<synchronous>, transform_indices = @transform_3, window_bounds = array<i64: 16, 256>}, {pipeline_mode = #tpu.pipeline_mode<synchronous>, transform_indices = @transform_4, window_bounds = array<i64: 1, 256>}, {pipeline_mode = #tpu.pipeline_mode<synchronous>, transform_indices = @transform_5, window_bounds = array<i64: 256, 256>}, {pipeline_mode = #tpu.pipeline_mode<synchronous>, transform_indices = @transform_6, window_bounds = array<i64: 1, 256>}, {pipeline_mode = #tpu.pipeline_mode<synchronous>, transform_indices = @transform_7, window_bounds = array<i64: 256, 128>}, {pipeline_mode = #tpu.pipeline_mode<synchronous>, transform_indices = @transform_8, window_bounds = array<i64: 1, 128>}, {transform_indices = @transform_9, window_bounds = array<i64: 8, 128>}]} {
    %c0 = arith.constant 0 : index
    %c0_0 = arith.constant 0 : index
    %0 = vector.load %arg1[%c0, %c0_0] : memref<8x32xf32, #tpu.memory_space<vmem>>, vector<8x32xf32>
    %1 = arith.truncf %0 : vector<8x32xf32> to vector<8x32xbf16>
    %c0_1 = arith.constant 0 : index
    %c0_2 = arith.constant 0 : index
    %2 = vector.load %arg3[%c0_1, %c0_2] : memref<32x256xbf16, #tpu.memory_space<vmem>>, vector<32x256xbf16>
    %cst = arith.constant dense<0.000000e+00> : vector<8x256xf32>
    %3 = tpu.matmul %1, %2, %cst {dimension_numbers = #tpu.dot_dimension_numbers<[1], [0], [0], [1], [0, 0, 1, 1], [], []>} : vector<8x32xbf16>, vector<32x256xbf16>, vector<8x256xf32> -> vector<8x256xf32>
    %c0_3 = arith.constant 0 : index
    %c0_4 = arith.constant 0 : index
    %4 = vector.load %arg2[%c0_3, %c0_4] : memref<8x16xf32, #tpu.memory_space<vmem>>, vector<8x16xf32>
    %5 = arith.truncf %4 : vector<8x16xf32> to vector<8x16xbf16>
    %c0_5 = arith.constant 0 : index
    %c0_6 = arith.constant 0 : index
    %6 = vector.load %arg4[%c0_5, %c0_6] : memref<16x256xbf16, #tpu.memory_space<vmem>>, vector<16x256xbf16>
    %cst_7 = arith.constant dense<0.000000e+00> : vector<8x256xf32>
    %7 = tpu.matmul %5, %6, %cst_7 {dimension_numbers = #tpu.dot_dimension_numbers<[1], [0], [0], [1], [0, 0, 1, 1], [], []>} : vector<8x16xbf16>, vector<16x256xbf16>, vector<8x256xf32> -> vector<8x256xf32>
    %8 = arith.addf %3, %7 : vector<8x256xf32>
    %c0_8 = arith.constant 0 : index
    %c0_9 = arith.constant 0 : index
    %9 = vector.load %arg5[%c0_8, %c0_9] : memref<1x256xf32, #tpu.memory_space<vmem>>, vector<1x256xf32>
    %10 = vector.broadcast %9 : vector<1x256xf32> to vector<8x256xf32>
    %11 = arith.addf %8, %10 : vector<8x256xf32>
    %cst_10 = arith.constant 0.000000e+00 : f32
    %12 = vector.broadcast %cst_10 : f32 to vector<8x256xf32>
    %13 = arith.cmpf ogt, %11, %12 : vector<8x256xf32>
    %cst_11 = arith.constant 2.000000e-01 : f32
    %14 = vector.broadcast %cst_11 : f32 to vector<8x256xf32>
    %15 = arith.mulf %14, %11 : vector<8x256xf32>
    %16 = arith.select %13, %11, %15 : vector<8x256xi1>, vector<8x256xf32>
    %17 = arith.truncf %16 : vector<8x256xf32> to vector<8x256xbf16>
    %c0_12 = arith.constant 0 : index
    %c0_13 = arith.constant 0 : index
    %18 = vector.load %arg6[%c0_12, %c0_13] : memref<256x256xbf16, #tpu.memory_space<vmem>>, vector<256x256xbf16>
    %cst_14 = arith.constant dense<0.000000e+00> : vector<8x256xf32>
    %19 = tpu.matmul %17, %18, %cst_14 {dimension_numbers = #tpu.dot_dimension_numbers<[1], [0], [0], [1], [0, 0, 1, 1], [], []>} : vector<8x256xbf16>, vector<256x256xbf16>, vector<8x256xf32> -> vector<8x256xf32>
    %c0_15 = arith.constant 0 : index
    %c0_16 = arith.constant 0 : index
    %20 = vector.load %arg7[%c0_15, %c0_16] : memref<1x256xf32, #tpu.memory_space<vmem>>, vector<1x256xf32>
    %21 = vector.broadcast %20 : vector<1x256xf32> to vector<8x256xf32>
    %22 = arith.addf %19, %21 : vector<8x256xf32>
    %cst_17 = arith.constant 0.000000e+00 : f32
    %23 = vector.broadcast %cst_17 : f32 to vector<8x256xf32>
    %24 = arith.cmpf ogt, %22, %23 : vector<8x256xf32>
    %cst_18 = arith.constant 2.000000e-01 : f32
    %25 = vector.broadcast %cst_18 : f32 to vector<8x256xf32>
    %26 = arith.mulf %25, %22 : vector<8x256xf32>
    %27 = arith.select %24, %22, %26 : vector<8x256xi1>, vector<8x256xf32>
    %28 = arith.truncf %27 : vector<8x256xf32> to vector<8x256xbf16>
    %c0_19 = arith.constant 0 : index
    %c0_20 = arith.constant 0 : index
    %29 = vector.load %arg8[%c0_19, %c0_20] : memref<256x128xbf16, #tpu.memory_space<vmem>>, vector<256x128xbf16>
    %cst_21 = arith.constant dense<0.000000e+00> : vector<8x128xf32>
    %30 = tpu.matmul %28, %29, %cst_21 {dimension_numbers = #tpu.dot_dimension_numbers<[1], [0], [0], [1], [0, 0, 1, 1], [], []>} : vector<8x256xbf16>, vector<256x128xbf16>, vector<8x128xf32> -> vector<8x128xf32>
    %c0_22 = arith.constant 0 : index
    %c0_23 = arith.constant 0 : index
    %31 = vector.load %arg9[%c0_22, %c0_23] : memref<1x128xf32, #tpu.memory_space<vmem>>, vector<1x128xf32>
    %32 = vector.broadcast %31 : vector<1x128xf32> to vector<8x128xf32>
    %33 = arith.addf %30, %32 : vector<8x128xf32>
    %c0_24 = arith.constant 0 : index
    %c0_25 = arith.constant 0 : index
    %34 = vector.load %arg10[%c0_24, %c0_25] : memref<8x128xf32, #tpu.memory_space<vmem>>, vector<8x128xf32>
    tpu.vector_store %arg10[%c0_24, %c0_25], %33 {strides = array<i32>} : memref<8x128xf32, #tpu.memory_space<vmem>>, vector<8x128xf32>,
    return
  }
  func.func @transform_0(%arg0: i32) -> (i32, i32) {
    %c0_i32 = arith.constant 0 : i32
    %c0_i32_0 = arith.constant 0 : i32
    return %arg0, %c0_i32 : i32, i32
  }
  func.func @transform_1(%arg0: i32) -> (i32, i32) {
    %c0_i32 = arith.constant 0 : i32
    %c0_i32_0 = arith.constant 0 : i32
    return %arg0, %c0_i32 : i32, i32
  }
  func.func @transform_2(%arg0: i32) -> (i32, i32) {
    %c0_i32 = arith.constant 0 : i32
    %c0_i32_0 = arith.constant 0 : i32
    %c0_i32_1 = arith.constant 0 : i32
    return %c0_i32, %c0_i32_0 : i32, i32
  }
  func.func @transform_3(%arg0: i32) -> (i32, i32) {
    %c0_i32 = arith.constant 0 : i32
    %c0_i32_0 = arith.constant 0 : i32
    %c0_i32_1 = arith.constant 0 : i32
    return %c0_i32, %c0_i32_0 : i32, i32
  }
  func.func @transform_4(%arg0: i32) -> (i32, i32) {
    %c0_i32 = arith.constant 0 : i32
    %c0_i32_0 = arith.constant 0 : i32
    %c0_i32_1 = arith.constant 0 : i32
    return %c0_i32, %c0_i32_0 : i32, i32
  }
  func.func @transform_5(%arg0: i32) -> (i32, i32) {
    %c0_i32 = arith.constant 0 : i32
    %c0_i32_0 = arith.constant 0 : i32
    %c0_i32_1 = arith.constant 0 : i32
    return %c0_i32, %c0_i32_0 : i32, i32
  }
  func.func @transform_6(%arg0: i32) -> (i32, i32) {
    %c0_i32 = arith.constant 0 : i32
    %c0_i32_0 = arith.constant 0 : i32
    %c0_i32_1 = arith.constant 0 : i32
    return %c0_i32, %c0_i32_0 : i32, i32
  }
  func.func @transform_7(%arg0: i32) -> (i32, i32) {
    %c0_i32 = arith.constant 0 : i32
    %c0_i32_0 = arith.constant 0 : i32
    %c0_i32_1 = arith.constant 0 : i32
    return %c0_i32, %c0_i32_0 : i32, i32
  }
  func.func @transform_8(%arg0: i32) -> (i32, i32) {
    %c0_i32 = arith.constant 0 : i32
    %c0_i32_0 = arith.constant 0 : i32
    %c0_i32_1 = arith.constant 0 : i32
    return %c0_i32, %c0_i32_0 : i32, i32
  }
  func.func @transform_9(%arg0: i32) -> (i32, i32) {
    %c0_i32 = arith.constant 0 : i32
    %c0_i32_0 = arith.constant 0 : i32
    return %arg0, %c0_i32 : i32, i32
  }
}

</mosaic_0001>

<bundles_post_ra>
// kernel: generator_forward.1
= control target key start
LH: loop header
LB: loop body
LE: loop exit
PB: predicated region body
PF: predicated region fallthrough
CT: control target
= control target key end

     0   :  { %v805_v2 = vmov 0   ;;  %vm54_vm0 = vcmask 130048   ;;  %vm119_vm1 = vcmask 261120   ;;  %s1037_s0 = inlined_call_operand.vmem [shape: f32[8,32], index: 0, kind: input, shape index: {}]   ;;  %s1038_s1 = inlined_call_operand.vmem [shape: f32[8,16], index: 1, kind: input, shape index: {}]   ;;  %s1039_s2 = inlined_call_operand.vmem [shape: bf16[32,256], index: 2, kind: input, shape index: {}]   ;;  %s1040_s3 = inlined_call_operand.vmem [shape: bf16[16,256], index: 3, kind: input, shape index: {}]   ;;  %s1041_s4 = inlined_call_operand.vmem [shape: f32[1,256], index: 4, kind: input, shape index: {}]   ;;  %s1042_s5 = inlined_call_operand.vmem [shape: bf16[256,256], index: 5, kind: input, shape index: {}]   ;;  %s1043_s6 = inlined_call_operand.vmem [shape: f32[1,256], index: 6, kind: input, shape index: {}]   ;;  %s1044_s7 = inlined_call_operand.vmem [shape: bf16[256,128], index: 7, kind: input, shape index: {}]   ;;  %s1045_s8 = inlined_call_operand.vmem [shape: f32[1,128], index: 8, kind: input, shape index: {}]   ;;  %s1046_s9 = inlined_call_operand.hbm [shape: f32[8,128], index: 9, kind: output, shape index: {}]  }
   0x1   :  { %v710_v0 = vld [vmem:[%s1040_s3 + $0x4] ss:$8 sps:$4 sm:$0xff]   ;;  %v712_v1 = vld [vmem:[%s1040_s3] ss:$8 sps:$4 sm:$0xff]   ;;  %90 = vmatprep.mubr.bf16.mxu1 %v805_v2  ;;  %v715_v5 = vld [vmem:[%s1039_s2 + $0x14] ss:$8 sps:$4 sm:$0xff]  }
   0x2   :  { %v40_v3 = vld [vmem:[%s1038_s1] sm:$0xff]  ;;  %72 = vmatprep.subr.bf16.mxu1 %v710_v0  ;;  %v713_v6 = vld [vmem:[%s1039_s2 + $0x10] ss:$8 sps:$4 sm:$0xff]   ;;  %v719_v9 = vld [vmem:[%s1042_s5 + $0x74] ss:$8 sps:$4 sm:$0xff]  }
   0x3   :  { %v41_v4 = vpack.c.bf16 %v40_v3, %v40_v3  ;;  %73 = vmatpush1.bf16.msra.mxu1 %v712_v1  ;;  %v718_v7 = vld [vmem:[%s1039_s2 + $0x4] ss:$8 sps:$4 sm:$0xff]   ;;  %v716_v8 = vld [vmem:[%s1039_s2] ss:$8 sps:$4 sm:$0xff]   ;;  %v721_v10 = vld [vmem:[%s1042_s5 + $0x70] ss:$8 sps:$4 sm:$0xff]   ;;  %390 = vmatprep.subr.bf16.mxu0 %v719_v9 }
   0x4   :  { %135 = vmatprep.subr.bf16.mxu1 %v715_v5  ;;  %v722_v11 = vld [vmem:[%s1042_s5 + $0x64] ss:$8 sps:$4 sm:$0xff]   ;;  %391 = vmatpush1.bf16.msra.mxu0 %v721_v10  ;;  %v724_v13 = vld [vmem:[%s1042_s5 + $0x60] ss:$8 sps:$4 sm:$0xff]   ;;  %v725_v15 = vld [vmem:[%s1042_s5 + $0x54] ss:$8 sps:$4 sm:$0xff]  }
   0x5   :  { %v34_v12 = vld [vmem:[%s1037_s0] sm:$0xff]  ;;  %392 = vmatprep.subr.bf16.mxu0 %v722_v11  ;;  %v727_v16 = vld [vmem:[%s1042_s5 + $0x50] ss:$8 sps:$4 sm:$0xff]   ;;  %v731_v19 = vld [vmem:[%s1042_s5 + $0x34] ss:$8 sps:$4 sm:$0xff]  }
   0x6   :  { %631 = vmatmul.mubr.msk.bf16.vlgmr.msra.gmra.mxu1 %vm54_vm0, %v41_v4  ;;  %v35_v14 = vpack.c.bf16 %v34_v12, %v34_v12  ;;  %v728_v17 = vld [vmem:[%s1042_s5 + $0x44] ss:$8 sps:$4 sm:$0xff]   ;;  %v730_v18 = vld [vmem:[%s1042_s5 + $0x40] ss:$8 sps:$4 sm:$0xff]   ;;  %v733_v20 = vld [vmem:[%s1042_s5 + $0x30] ss:$8 sps:$4 sm:$0xff]  }
   0x7   :  { %136 = vmatpush1.bf16.msra.mxu1 %v713_v6  ;;  %155 = vmatprep.mubr.bf16.mxu1 %v805_v2  ;;  %v734_v21 = vld [vmem:[%s1042_s5 + $0x24] ss:$8 sps:$4 sm:$0xff]   ;;  %v736_v22 = vld [vmem:[%s1042_s5 + $0x20] ss:$8 sps:$4 sm:$0xff]   ;;  %v737_v23 = vld [vmem:[%s1042_s5 + $0x14] ss:$8 sps:$4 sm:$0xff]  }
   0x8   :  { %137 = vmatprep.subr.bf16.mxu1 %v718_v7  ;;  %393 = vmatpush1.bf16.msra.mxu0 %v724_v13  ;;  %v739_v24 = vld [vmem:[%s1042_s5 + $0x10] ss:$8 sps:$4 sm:$0xff]   ;;  %v740_v25 = vld [vmem:[%s1042_s5 + $0x4] ss:$8 sps:$4 sm:$0xff]   ;;  %v742_v26 = vld [vmem:[%s1042_s5] ss:$8 sps:$4 sm:$0xff]  }
   0x9   :  { %394 = vmatprep.subr.bf16.mxu0 %v725_v15 }
   0xb   :  { %138 = vmatpush1.bf16.msra.mxu1 %v716_v8 }
   0xc   :  { %395 = vmatpush1.bf16.msra.mxu0 %v727_v16 }
   0xd   :  { %396 = vmatprep.subr.bf16.mxu0 %v728_v17 }
   0xe   :  { %636 = vmatmul.mubr.msk.bf16.vlgmr.msra.gmra.mxu1 %vm119_vm1, %v35_v14 }
  0x10   :  { %397 = vmatpush1.bf16.msra.mxu0 %v730_v18 }
  0x11   :  { %398 = vmatprep.subr.bf16.mxu0 %v731_v19 }
  0x14   :  { %399 = vmatpush1.bf16.msra.mxu0 %v733_v20 }
  0x15   :  { %400 = vmatprep.subr.bf16.mxu0 %v734_v21 }
  0x18   :  { %401 = vmatpush1.bf16.msra.mxu0 %v736_v22 }
  0x19   :  { %402 = vmatprep.subr.bf16.mxu0 %v737_v23 }
  0x1c   :  { %403 = vmatpush1.bf16.msra.mxu0 %v739_v24 }
  0x1d   :  { %14 = vsyncpa [#allocation3], 0  ;;  %404 = vmatprep.subr.bf16.mxu0 %v740_v25  ;;  %v743_v27 = vld [vmem:[%s1042_s5 + $0xf4] ss:$8 sps:$4 sm:$0xff]   ;;  %v745_v28 = vld [vmem:[%s1042_s5 + $0xf0] ss:$8 sps:$4 sm:$0xff]   ;;  %v166_v54 = vlaneseq }
  0x1e   :  { %v746_v29 = vld [vmem:[%s1042_s5 + $0xe4] ss:$8 sps:$4 sm:$0xff]   ;;  %v748_v30 = vld [vmem:[%s1042_s5 + $0xe0] ss:$8 sps:$4 sm:$0xff]   ;;  %v749_v31 = vld [vmem:[%s1042_s5 + $0xd4] ss:$8 sps:$4 sm:$0xff]  }
  0x1f   :  { %v751_v32 = vld [vmem:[%s1042_s5 + $0xd0] ss:$8 sps:$4 sm:$0xff]   ;;  %v752_v33 = vld [vmem:[%s1042_s5 + $0xc4] ss:$8 sps:$4 sm:$0xff]   ;;  %v754_v34 = vld [vmem:[%s1042_s5 + $0xc0] ss:$8 sps:$4 sm:$0xff]  }
  0x20   :  { %405 = vmatpush1.bf16.msra.mxu0 %v742_v26  ;;  %v755_v35 = vld [vmem:[%s1042_s5 + $0xb4] ss:$8 sps:$4 sm:$0xff]   ;;  %v757_v36 = vld [vmem:[%s1042_s5 + $0xb0] ss:$8 sps:$4 sm:$0xff]   ;;  %v758_v37 = vld [vmem:[%s1042_s5 + $0xa4] ss:$8 sps:$4 sm:$0xff]  }
  0x21   :  { %406 = vmatprep.subr.bf16.mxu0 %v743_v27  ;;  %v760_v38 = vld [vmem:[%s1042_s5 + $0xa0] ss:$8 sps:$4 sm:$0xff]   ;;  %v761_v39 = vld [vmem:[%s1042_s5 + $0x94] ss:$8 sps:$4 sm:$0xff]   ;;  %v763_v40 = vld [vmem:[%s1042_s5 + $0x90] ss:$8 sps:$4 sm:$0xff]  }
  0x22   :  { %v764_v41 = vld [vmem:[%s1042_s5 + $0x84] ss:$8 sps:$4 sm:$0xff]   ;;  %v766_v42 = vld [vmem:[%s1042_s5 + $0x80] ss:$8 sps:$4 sm:$0xff]   ;;  %v767_v43 = vld [vmem:[%s1044_s7 + $0x78] sm:$0xff]   ;;  %v167_v55 = vshrl.u32 %v166_v54, 7 }
  0x23   :  { %v768_v44 = vld [vmem:[%s1044_s7 + $0x38] sm:$0xff]   ;;  %v769_v45 = vld [vmem:[%s1044_s7 + $0x70] sm:$0xff]   ;;  %686 = vmatprep.subr.bf16.mxu1 %v767_v43  ;;  %v771_v47 = vld [vmem:[%s1044_s7 + $0x68] sm:$0xff]   ;;  %s806_s21 = smov [#allocation2]  }
  0x24   :  { %407 = vmatpush2.bf16.msra.mxu0 %v745_v28  ;;  %687 = vmatpush3.bf16.msra.mxu1 %v768_v44  ;;  %v770_v46 = vld [vmem:[%s1044_s7 + $0x30] sm:$0xff]   ;;  %v772_v48 = vld [vmem:[%s1044_s7 + $0x28] sm:$0xff]   ;;  %v773_v49 = vld [vmem:[%s1044_s7 + $0x60] sm:$0xff]   ;;  %v168_v58 = vsub.s32 0, %v167_v55  ;;  %v172_v61 = vsub.s32 1, %v167_v55  ;;  %s621_s1 = sshll.u32 %s806_s21, 4  ;;  %s622_s1 = int_to_ptr.vmem [resolvable:$true] %s621_s1 }
  0x25   :  { %408 = vmatprep.subr.bf16.mxu0 %v746_v29  ;;  %688 = vmatprep.subr.bf16.mxu1 %v769_v45  ;;  %v774_v50 = vld [vmem:[%s1044_s7 + $0x20] sm:$0xff]   ;;  %v775_v51 = vld [vmem:[%s1044_s7 + $0x58] sm:$0xff]   ;;  %v777_v53 = vld [vmem:[%s1044_s7 + $0x50] sm:$0xff]   ;;  %s783_s22 = scalar_lea.vmem %s622_s1, 128  ;;  %p788_p1 = scmp.lt.s32.totalorder %s622_s1, %s622_s1 }
  0x26   :  { %v776_v52 = vld [vmem:[%s1044_s7 + $0x18] sm:$0xff]   ;;  %v164_v60 = vld [vmem:[%s1041_s4] sm:$0x3]  ;;  %v778_v15 = vld [vmem:[%s1044_s7 + $0x10] sm:$0xff]   ;;  %p784_p0 = scmp.ne.s32.totalorder %s622_s1, %s783_s22  ;;  %p789_p2 = scmp.lt.s32.totalorder %s783_s22, %s783_s22 }
  0x27   :  { %v169_v63 = vrot.slane %v164_v60, %v168_v58  ;;  %v173_v2 = vrot.slane %v164_v60, %v172_v61  ;;  %v779_v16 = vld [vmem:[%s1044_s7 + $0x48] sm:$0xff]   ;;  %v781_v18 = vld [vmem:[%s1044_s7 + $0x40] sm:$0xff]  }
  0x28   :  { %409 = vmatpush2.bf16.msra.mxu0 %v748_v30  ;;  %689 = vmatpush3.bf16.msra.mxu1 %v770_v46  ;;  %v780_v17 = vld [vmem:[%s1044_s7 + $0x8] sm:$0xff]   ;;  %v782_v19 = vld [vmem:[%s1044_s7] sm:$0xff]   ;;  %p790_p3 = por %p789_p2, %p788_p1 }
  0x29   :  { %410 = vmatprep.subr.bf16.mxu0 %v749_v31  ;;  %690 = vmatprep.subr.bf16.mxu1 %v771_v47  ;;  %v218_v20 = vld [vmem:[%s1043_s6] sm:$0x3] }
  0x2a   :  { %v223_v21 = vrot.slane %v218_v20, %v168_v58  ;;  %v227_v22 = vrot.slane %v218_v20, %v172_v61  ;;  %p791_p4 = pnand %p790_p3, %p784_p0 }
  0x2c   :  { %411 = vmatpush2.bf16.msra.mxu0 %v751_v32  ;;  %691 = vmatpush3.bf16.msra.mxu1 %v772_v48 }
  0x2d   :  { %412 = vmatprep.subr.bf16.mxu0 %v752_v33  ;;  %692 = vmatprep.subr.bf16.mxu1 %v773_v49 }
  0x30   :  { %413 = vmatpush2.bf16.msra.mxu0 %v754_v34  ;;  %693 = vmatpush3.bf16.msra.mxu1 %v774_v50 }
  0x31   :  { %414 = vmatprep.subr.bf16.mxu0 %v755_v35  ;;  %694 = vmatprep.subr.bf16.mxu1 %v775_v51 }
  0x34   :  { %415 = vmatpush2.bf16.msra.mxu0 %v757_v36  ;;  %695 = vmatpush3.bf16.msra.mxu1 %v776_v52 }
  0x35   :  { %416 = vmatprep.subr.bf16.mxu0 %v758_v37  ;;  %696 = vmatprep.subr.bf16.mxu1 %v777_v53  ;;  %v669_v37 = vld [vmem:[%s1045_s8] ss:$0 sm:$0xff] }
  0x38   :  { %417 = vmatpush2.bf16.msra.mxu0 %v760_v38  ;;  %697 = vmatpush3.bf16.msra.mxu1 %v778_v15 }
  0x39   :  { %418 = vmatprep.subr.bf16.mxu0 %v761_v39  ;;  %698 = vmatprep.subr.bf16.mxu1 %v779_v16 }
  0x3c   :  { %419 = vmatpush2.bf16.msra.mxu0 %v763_v40  ;;  %699 = vmatpush3.bf16.msra.mxu1 %v780_v17 }
  0x3d   :  { %420 = vmatprep.subr.bf16.mxu0 %v764_v41  ;;  %700 = vmatprep.subr.bf16.mxu1 %v781_v18 }
  0x40   :  { %421 = vmatpush2.bf16.msra.mxu0 %v766_v42  ;;  %701 = vmatpush3.bf16.msra.mxu1 %v782_v19 }
  0xc6   :  { %v92_v56 = vpop.f32.mrf.mxu1 }
  0xc8   :  { %v94_v57 = vpop.f32.mrf.mxu1 }
  0xca   :  { %v96_v59 = vpop.f32.mrf.mxu1 }
  0xcc   :  { %v97_v62 = vpop.f32.mrf.mxu1 }
  0xce   :  { %v157_v0 = vpop.f32.mrf.mxu1 }
  0xcf   :  { %v158_v1 = vadd.f32 %v157_v0, %v92_v56 }
  0xd0   :  { %v159_v3 = vpop.f32.mrf.mxu1 }
  0xd1   :  { %v176_v4 = vadd.f32 %v169_v63, %v158_v1  ;;  %v160_v5 = vadd.f32 %v159_v3, %v94_v57 }
  0xd2   :  { %v161_v6 = vpop.f32.mrf.mxu1 }
  0xd3   :  { %v180_v7 = vmul.f32 0.2, %v176_v4  ;;  %v177_v8 = vadd.f32 %v173_v2, %v160_v5  ;;  %vm178_vm2 = vcmp.gt.f32.partialorder %v176_v4, 0.0 }
  0xd4   :  { %v162_v9 = vpop.f32.mrf.mxu1 }
  0xd5   :  { %vm179_vm3 = vcmp.gt.f32.partialorder %v177_v8, 0.0  ;;  %v181_v10 = vmul.f32 0.2, %v177_v8  ;;  %v182_v11 = vsel %vm178_vm2, %v176_v4, %v180_v7 }
  0xd6   :  { %v184_v14 = vpack.c.bf16 %v182_v11, %v182_v11 }
  0xd7   :  { %v183_v12 = vsel %vm179_vm3, %v177_v8, %v181_v10 }
  0xd8   :  { %v185_v13 = vpack.c.bf16 %v183_v12, %v183_v12 }
  0xda   :  { %422 = vmatprep.mubr.bf16.mxu0 %v185_v13 }
  0xdb   :  { %423 = vmatmul.mubr.bf16.vlgmr.msra.gmra.mxu0 %v184_v14 }
 0x19b   :  { %v424_v23 = vpop.f32.mrf.mxu0 }
 0x19c   :  { %v425_v24 = vadd.f32 %v424_v23, %v223_v21 }
 0x19d   :  { %v426_v25 = vpop.f32.mrf.mxu0 }
 0x19e   :  { %vm431_vm4 = vcmp.gt.f32.partialorder %v425_v24, 0.0  ;;  %v433_v26 = vmul.f32 0.2, %v425_v24  ;;  %v427_v27 = vadd.f32 %v426_v25, %v227_v22 }
 0x19f   :  { %v428_v28 = vpop.f32.mrf.mxu0 }
 0x1a0   :  { %vm432_vm5 = vcmp.gt.f32.partialorder %v427_v27, 0.0  ;;  %v434_v29 = vmul.f32 0.2, %v427_v27  ;;  %v435_v30 = vsel %vm431_vm4, %v425_v24, %v433_v26 }
 0x1a1   :  { %v429_v31 = vpop.f32.mrf.mxu0  ;;  %v437_v34 = vpack.c.bf16 %v435_v30, %v435_v30 }
 0x1a2   :  { %v436_v32 = vsel %vm432_vm5, %v427_v27, %v434_v29 }
 0x1a3   :  { %v438_v33 = vpack.c.bf16 %v436_v32, %v436_v32 }
 0x1a5   :  { %606 = vmatprep.mubr.bf16.mxu1 %v438_v33 }
 0x1a6   :  { %607 = vmatmul.mubr.bf16.vlgmr.msra.gmra.mxu1 %v437_v34 }
 0x266   :  { %v702_v35 = vpop.f32.mrf.mxu1 }
 0x268   :  { %v703_v36 = vpop.f32.mrf.mxu1 }
 0x269   :  { %v704_v38 = vadd.f32 %v703_v36, %v702_v35 }
 0x26a   :  { %v705_v39 = vpop.f32.mrf.mxu1 }
 0x26b   :  { %v609_v40 = vadd.f32 %v704_v38, %v669_v37 }
 0x26c   :  { %v706_v41 = vpop.f32.mrf.mxu1 }
 0x26d   :  { %614 = vst [vmem:[#allocation2] sm:$0xff] %v609_v40 }
 0x26e   :  { %794 = shalt.err (!%p791_p4)
}
 0x26f   :  { %624 = dma.vmem_to_hbm [thread:$0]  %s622_s1, 128, %s1046_s9, [#allocation3]  }
 0x270   :  { %803 = dma.done.wait [#allocation3], 128  }
 0x271   :  { %804 = vsyncadd [#allocation3], 4294967168 }
 0x272   :  { %628 = vsyncpa [#allocation3], 1 }

</bundles_post_ra>
